<compile_context>
chip_gen: v7x
topology: tpu7x:2x2x1
jax: 0.10.0
libtpu: 0.0.40
codegen_flags: <defaults>
</compile_context>

<pallas_src>
import functools
import math

import jax
import jax.numpy as jnp
from jax.experimental import pallas as pl
from jax.experimental.pallas import tpu as pltpu

EPS = 1e-5  # PyTorch BatchNorm2d default eps


# ----------------------------------------------------------------------------
# Fused kernel: conv1 -> bn1 -> relu -> conv2 -> bn2 -> +residual -> relu
# ----------------------------------------------------------------------------
def residual_block_kernel(N, H, W,
                          x_ref, band1_ref, band2_ref, g1_ref, be1_ref,
                          g2_ref, be2_ref, fold_ref, unfold_ref, mask_ref,
                          o_ref, pad_ref):
    """Everything stays resident in VMEM in a lane-dense (rows, W*Cpad) layout.

    x_ref      : (N*H, WC)   input, NHWC with (W, Cpad) flattened onto lanes
    band*_ref  : (3, WC, WC) banded conv weights, one (WC, WC) per kh tap
    g*/be*_ref : (1, Cpad)   BatchNorm gamma / beta (padded channels: 1 / 0)
    fold_ref   : (WC, Cpad)  0/1 matrix folding (w, c) columns -> channel
    unfold_ref : (Cpad, WC)  its transpose (per-channel -> (w, c) lanes)
    mask_ref   : (M, WC)     1.0 on valid rows, 0.0 on the N-1 separator rows
    o_ref      : (N*H, WC)   output
    pad_ref    : (>=P, WC)   shared-separator H-padded scratch, P = N*(H+1)+1
    """
    WC = x_ref.shape[1]
    P = N * (H + 1) + 1
    M = P - 2                       # conv output rows (incl. separator rows)
    inv_cnt = 1.0 / float(N * H * W)

    # Zero only the N+1 shared zero-pad rows; image interiors get overwritten.
    zero_row = jnp.zeros((1, WC), jnp.float32)
    for n in range(N + 1):
        pad_ref[pl.ds(n * (H + 1), 1), :] = zero_row

    # Scatter the input into the interiors (contiguous row-window stores).
    for n in range(N):
        pad_ref[pl.ds(n * (H + 1) + 1, H), :] = x_ref[pl.ds(n * H, H), :]

    def conv_bn(band_ref, g_ref, be_ref):
        # 3x3 SAME conv = 3 row-shifted contiguous-window MXU matmuls with
        # K = N = WC; accumulator starts from the kh=0 tap.
        acc = jnp.dot(pad_ref[pl.ds(0, M), :], band_ref[0],
                      preferred_element_type=jnp.float32)
        acc = acc + jnp.dot(pad_ref[pl.ds(1, M), :], band_ref[1],
                            preferred_element_type=jnp.float32)
        acc = acc + jnp.dot(pad_ref[pl.ds(2, M), :], band_ref[2],
                            preferred_element_type=jnp.float32)
        # Conv bias omitted: BN's mean subtraction cancels it exactly.
        # Single-pass batch stats over the valid rows (mask kills separators),
        # folded to per-channel with one small matmul and expanded back to the
        # (w, c) lane layout with one small matmul.
        accm = acc * mask_ref[...]                                  # (M, WC)
        stats = jnp.concatenate(
            [jnp.sum(accm, axis=0, keepdims=True),                  # sum
             jnp.sum(accm * acc, axis=0, keepdims=True)],           # sum sq
            axis=0)                                                 # (2, WC)
        stats_c = jnp.dot(stats, fold_ref[...],
                          preferred_element_type=jnp.float32)       # (2, C)
        mean = stats_c[0:1] * inv_cnt                               # (1, C)
        var = stats_c[1:2] * inv_cnt - mean * mean                  # biased
        scale_c = g_ref[...] * jax.lax.rsqrt(var + EPS)             # (1, C)
        shift_c = be_ref[...] - mean * scale_c                      # (1, C)
        ss = jnp.dot(jnp.concatenate([scale_c, shift_c], axis=0),
                     unfold_ref[...],
                     preferred_element_type=jnp.float32)            # (2, WC)
        return acc * ss[0:1] + ss[1:2]                              # (M, WC)

    # conv1 -> bn1 -> relu; h1 never leaves VMEM.
    h1 = jnp.maximum(conv_bn(band1_ref, g1_ref, be1_ref), 0.0)

    # Re-pad the interiors with h1 (zero rows untouched, separators dropped).
    for n in range(N):
        r0 = n * (H + 1)
        pad_ref[pl.ds(r0 + 1, H), :] = h1[r0:r0 + H, :]

    # conv2 -> bn2 -> +residual -> relu; write only the valid rows
    # (lane-dense, unmasked stores).
    y = conv_bn(band2_ref, g2_ref, be2_ref)
    for n in range(N):
        r0 = n * (H + 1)
        o_ref[pl.ds(n * H, H), :] = jnp.maximum(
            y[r0:r0 + H, :] + x_ref[pl.ds(n * H, H), :], 0.0)


# ----------------------------------------------------------------------------
# Wrapper-side weight plumbing (built ONCE, off the per-call path)
# ----------------------------------------------------------------------------
def _band_weights(w_hwio, W, C):
    """(3,3,C,C) HWIO -> (3, W*C, W*C) banded matrices, one per kh tap.

    band[dh][(w+dw-1)*C + cin, w*C + cout] = w_hwio[dh, dw, cin, cout]
    (taps that would read the zero W-padding are simply absent from the band).
    """
    bands = []
    for dh in range(3):
        m = jnp.zeros((W * C, W * C), jnp.float32)
        for dw in range(3):
            shift = jnp.eye(W, k=1 - dw, dtype=jnp.float32)
            m = m + jnp.kron(shift, w_hwio[dh, dw])
        bands.append(m)
    return jnp.stack(bands)


def prepare_block(params, N, C, H, W):
    """Build kernel-ready constants once (bands, fold/unfold, mask, BN params)."""
    w1, b1, g1, be1, w2, b2, g2, be2 = params
    del b1, b2  # conv biases are mathematically dead under BatchNorm

    # Pad channels so W*Cpad is a multiple of 128 (full vregs / unmasked vst /
    # full MXU lanes).  Padded channels: zero weights, gamma=1, beta=0 =>
    # exactly zero through the whole block.
    step = 128 // math.gcd(W, 128)
    Cp = step * ((C + step - 1) // step)
    WC = W * Cp

    def pad_w(w):  # (3,3,C,C) -> (3,3,Cp,Cp), zero-padded in/out channels
        return jnp.pad(w.astype(jnp.float32),
                       ((0, 0), (0, 0), (0, Cp - C), (0, Cp - C)))

    def pad_gamma(g):  # pad with 1
        return jnp.concatenate(
            [g.reshape(1, C).astype(jnp.float32),
             jnp.ones((1, Cp - C), jnp.float32)], axis=1)

    def pad_beta(b):  # pad with 0
        return jnp.pad(b.reshape(1, C).astype(jnp.float32),
                       ((0, 0), (0, Cp - C)))

    M = N * (H + 1) - 1
    rows = jnp.arange(M)
    mask = ((rows + 1) % (H + 1) != 0).astype(jnp.float32).reshape(M, 1)
    mask = jnp.broadcast_to(mask, (M, WC))  # 0 on the N-1 separator rows

    return dict(
        band1=_band_weights(pad_w(w1), W, Cp),
        band2=_band_weights(pad_w(w2), W, Cp),
        g1=pad_gamma(g1), be1=pad_beta(be1),
        g2=pad_gamma(g2), be2=pad_beta(be2),
        fold=jnp.kron(jnp.ones((W, 1), jnp.float32),
                      jnp.eye(Cp, dtype=jnp.float32)),     # (WC, Cp)
        unfold=jnp.kron(jnp.ones((1, W), jnp.float32),
                        jnp.eye(Cp, dtype=jnp.float32)),   # (Cp, WC)
        mask=mask,
    )


def _vmem_limit_bytes(N, H, W, Cp):
    """Derive the scoped-VMEM request from actual buffer sizes (v7x-safe cap)."""
    WC = W * Cp
    P = N * (H + 1) + 1
    M = P - 2
    io_bytes = 4 * (2 * N * H * WC        # x + out
                    + 2 * 3 * WC * WC     # band1 + band2
                    + M * WC              # mask
                    + 2 * WC * Cp + 4 * Cp  # fold/unfold + gamma/beta
                    + P * WC)             # padded activation scratch
    live = io_bytes + 4 * 4 * M * WC      # acc / h1 / y style temporaries
    est = 2 * live + (4 << 20)            # layout padding + compiler slack
    return int(min(max(est, 8 << 20), 48 << 20))


@jax.jit
def residual_block_forward(x_nchw, prep):
    """ResidualBlock forward.  x_nchw: (N, C, H, W) float32 -> (N, C, H, W)."""
    N, C, H, W = x_nchw.shape
    Cp = prep["g1"].shape[1]
    WC = W * Cp
    P = N * (H + 1) + 1
    P_alloc = ((P + 7) // 8) * 8  # sublane-aligned scratch allocation

    # NCHW -> channel-padded, lane-dense (N*H, W*Cpad).  Layout glue only.
    x = jnp.transpose(x_nchw, (0, 2, 3, 1)).astype(jnp.float32)   # (N,H,W,C)
    x = jnp.pad(x, ((0, 0), (0, 0), (0, 0), (0, Cp - C)))
    x2d = x.reshape(N * H, WC)

    vmem = pl.BlockSpec(memory_space=pltpu.MemorySpace.VMEM)
    out2d = pl.pallas_call(
        functools.partial(residual_block_kernel, N, H, W),
        out_shape=jax.ShapeDtypeStruct((N * H, WC), jnp.float32),
        in_specs=[vmem] * 10,
        out_specs=vmem,
        scratch_shapes=[pltpu.VMEM((P_alloc, WC), jnp.float32)],
        compiler_params=pltpu.CompilerParams(
            vmem_limit_bytes=_vmem_limit_bytes(N, H, W, Cp)),
    )(x2d, prep["band1"], prep["band2"], prep["g1"], prep["be1"],
      prep["g2"], prep["be2"], prep["fold"], prep["unfold"], prep["mask"])

    out = out2d.reshape(N, H, W, Cp)[..., :C]
    return jnp.transpose(out, (0, 3, 1, 2))  # back to NCHW


# ----------------------------------------------------------------------------
# Deterministic parameter init (matches nn.Conv2d / nn.BatchNorm2d shapes)
# ----------------------------------------------------------------------------
def init_params(key, channels):
    ks = jax.random.split(key, 4)
    bound = (channels * 9) ** -0.5  # PyTorch conv default uniform bound
    w1 = jax.random.uniform(ks[0], (3, 3, channels, channels), jnp.float32,
                            -bound, bound)
    b1 = jax.random.uniform(ks[1], (1, channels), jnp.float32, -bound, bound)
    w2 = jax.random.uniform(ks[2], (3, 3, channels, channels), jnp.float32,
                            -bound, bound)
    b2 = jax.random.uniform(ks[3], (1, channels), jnp.float32, -bound, bound)
    g1 = jnp.ones((1, channels), jnp.float32)    # BN gamma default = 1
    be1 = jnp.zeros((1, channels), jnp.float32)  # BN beta default = 0
    g2 = jnp.ones((1, channels), jnp.float32)
    be2 = jnp.zeros((1, channels), jnp.float32)
    return (w1, b1, g1, be1, w2, b2, g2, be2)


# ----------------------------------------------------------------------------
# Pure-JAX reference (correctness check only; includes the conv bias)
# ----------------------------------------------------------------------------
def reference_forward(x_nchw, params):
    w1, b1, g1, be1, w2, b2, g2, be2 = params

    def conv(x, w, b):
        y = jax.lax.conv_general_dilated(
            x, w, window_strides=(1, 1), padding="SAME",
            dimension_numbers=("NCHW", "HWIO", "NCHW"))
        return y + b.reshape(1, -1, 1, 1)

    def bn(x, g, be):
        mean = jnp.mean(x, axis=(0, 2, 3), keepdims=True)
        var = jnp.mean((x - mean) ** 2, axis=(0, 2, 3), keepdims=True)
        return ((x - mean) * jax.lax.rsqrt(var + EPS)
                * g.reshape(1, -1, 1, 1) + be.reshape(1, -1, 1, 1))

    out = jax.nn.relu(bn(conv(x_nchw, w1, b1), g1, be1))
    out = bn(conv(out, w2, b2), g2, be2)
    return jax.nn.relu(out + x_nchw)


# ----------------------------------------------------------------------------
if __name__ == "__main__":
    key = jax.random.PRNGKey(0)
    k_x, k_p = jax.random.split(key)

    N, C, H, W = 2, 4, 16, 16
    x = jax.random.normal(k_x, (N, C, H, W), dtype=jnp.float32)
    params = init_params(k_p, C)

    prep = prepare_block(params, N, C, H, W)   # built once, off the call path
    out = residual_block_forward(x, prep)
    out = jax.block_until_ready(out)

    ref = reference_forward(x, params)
    assert out.shape == (N, C, H, W)
    assert jnp.allclose(out, ref, atol=1e-4, rtol=1e-4), (
        float(jnp.max(jnp.abs(out - ref))))

    print("KERNEL_OK")
</pallas_src>

<mosaic_0001>
module attributes {stable_mosaic.version = 11 : i64} {
  func.func @residual_block_kernel(%arg0: memref<32x128xf32, #tpu.memory_space<vmem>>, %arg1: memref<3x128x128xf32, #tpu.memory_space<vmem>>, %arg2: memref<3x128x128xf32, #tpu.memory_space<vmem>>, %arg3: memref<1x8xf32, #tpu.memory_space<vmem>>, %arg4: memref<1x8xf32, #tpu.memory_space<vmem>>, %arg5: memref<1x8xf32, #tpu.memory_space<vmem>>, %arg6: memref<1x8xf32, #tpu.memory_space<vmem>>, %arg7: memref<128x8xf32, #tpu.memory_space<vmem>>, %arg8: memref<8x128xf32, #tpu.memory_space<vmem>>, %arg9: memref<33x128xf32, #tpu.memory_space<vmem>>, %arg10: memref<32x128xf32, #tpu.memory_space<vmem>>, %arg11: memref<40x128xf32, #tpu.memory_space<vmem>>) attributes {dimension_semantics = [], scalar_prefetch = 0 : i64, scratch_operands = 1 : i64, tpu.core_type = #tpu.core_type<tc>} {
    %cst = arith.constant 0.000000e+00 : f32
    %0 = vector.broadcast %cst : f32 to vector<1x128xf32>
    %c0 = arith.constant 0 : index
    %c0_0 = arith.constant 0 : index
    %1 = vector.load %arg11[%c0, %c0_0] : memref<40x128xf32, #tpu.memory_space<vmem>>, vector<1x128xf32>
    tpu.vector_store %arg11[%c0, %c0_0], %0 {strides = array<i32>} : memref<40x128xf32, #tpu.memory_space<vmem>>, vector<1x128xf32>,
    %c17 = arith.constant 17 : index
    %c0_1 = arith.constant 0 : index
    %2 = vector.load %arg11[%c17, %c0_1] : memref<40x128xf32, #tpu.memory_space<vmem>>, vector<1x128xf32>
    tpu.vector_store %arg11[%c17, %c0_1], %0 {strides = array<i32>} : memref<40x128xf32, #tpu.memory_space<vmem>>, vector<1x128xf32>,
    %c34 = arith.constant 34 : index
    %c0_2 = arith.constant 0 : index
    %3 = vector.load %arg11[%c34, %c0_2] : memref<40x128xf32, #tpu.memory_space<vmem>>, vector<1x128xf32>
    tpu.vector_store %arg11[%c34, %c0_2], %0 {strides = array<i32>} : memref<40x128xf32, #tpu.memory_space<vmem>>, vector<1x128xf32>,
    %c0_3 = arith.constant 0 : index
    %c0_4 = arith.constant 0 : index
    %4 = vector.load %arg0[%c0_3, %c0_4] : memref<32x128xf32, #tpu.memory_space<vmem>>, vector<16x128xf32>
    %c1 = arith.constant 1 : index
    %c0_5 = arith.constant 0 : index
    %5 = vector.load %arg11[%c1, %c0_5] : memref<40x128xf32, #tpu.memory_space<vmem>>, vector<16x128xf32>
    tpu.vector_store %arg11[%c1, %c0_5], %4 {strides = array<i32>} : memref<40x128xf32, #tpu.memory_space<vmem>>, vector<16x128xf32>,
    %c16 = arith.constant 16 : index
    %c0_6 = arith.constant 0 : index
    %6 = vector.load %arg0[%c16, %c0_6] : memref<32x128xf32, #tpu.memory_space<vmem>>, vector<16x128xf32>
    %c18 = arith.constant 18 : index
    %c0_7 = arith.constant 0 : index
    %7 = vector.load %arg11[%c18, %c0_7] : memref<40x128xf32, #tpu.memory_space<vmem>>, vector<16x128xf32>
    tpu.vector_store %arg11[%c18, %c0_7], %6 {strides = array<i32>} : memref<40x128xf32, #tpu.memory_space<vmem>>, vector<16x128xf32>,
    %c0_8 = arith.constant 0 : index
    %c0_9 = arith.constant 0 : index
    %8 = vector.load %arg11[%c0_8, %c0_9] : memref<40x128xf32, #tpu.memory_space<vmem>>, vector<33x128xf32>
    %c0_10 = arith.constant 0 : index
    %c0_11 = arith.constant 0 : index
    %c0_12 = arith.constant 0 : index
    %9 = vector.load %arg1[%c0_10, %c0_11, %c0_12] : memref<3x128x128xf32, #tpu.memory_space<vmem>>, vector<1x128x128xf32>
    %10 = vector.shape_cast %9 : vector<1x128x128xf32> to vector<128x128xf32>
    %cst_13 = arith.constant dense<0.000000e+00> : vector<33x128xf32>
    %11 = tpu.matmul %8, %10, %cst_13 {dimension_numbers = #tpu.dot_dimension_numbers<[1], [0], [0], [1], [0, 0, 1, 1], [], []>} : vector<33x128xf32>, vector<128x128xf32>, vector<33x128xf32> -> vector<33x128xf32>
    %c1_14 = arith.constant 1 : index
    %c0_15 = arith.constant 0 : index
    %12 = vector.load %arg11[%c1_14, %c0_15] : memref<40x128xf32, #tpu.memory_space<vmem>>, vector<33x128xf32>
    %c1_16 = arith.constant 1 : index
    %c0_17 = arith.constant 0 : index
    %c0_18 = arith.constant 0 : index
    %13 = vector.load %arg1[%c1_16, %c0_17, %c0_18] : memref<3x128x128xf32, #tpu.memory_space<vmem>>, vector<1x128x128xf32>
    %14 = vector.shape_cast %13 : vector<1x128x128xf32> to vector<128x128xf32>
    %cst_19 = arith.constant dense<0.000000e+00> : vector<33x128xf32>
    %15 = tpu.matmul %12, %14, %cst_19 {dimension_numbers = #tpu.dot_dimension_numbers<[1], [0], [0], [1], [0, 0, 1, 1], [], []>} : vector<33x128xf32>, vector<128x128xf32>, vector<33x128xf32> -> vector<33x128xf32>
    %16 = arith.addf %11, %15 : vector<33x128xf32>
    %c2 = arith.constant 2 : index
    %c0_20 = arith.constant 0 : index
    %17 = vector.load %arg11[%c2, %c0_20] : memref<40x128xf32, #tpu.memory_space<vmem>>, vector<33x128xf32>
    %c2_21 = arith.constant 2 : index
    %c0_22 = arith.constant 0 : index
    %c0_23 = arith.constant 0 : index
    %18 = vector.load %arg1[%c2_21, %c0_22, %c0_23] : memref<3x128x128xf32, #tpu.memory_space<vmem>>, vector<1x128x128xf32>
    %19 = vector.shape_cast %18 : vector<1x128x128xf32> to vector<128x128xf32>
    %cst_24 = arith.constant dense<0.000000e+00> : vector<33x128xf32>
    %20 = tpu.matmul %17, %19, %cst_24 {dimension_numbers = #tpu.dot_dimension_numbers<[1], [0], [0], [1], [0, 0, 1, 1], [], []>} : vector<33x128xf32>, vector<128x128xf32>, vector<33x128xf32> -> vector<33x128xf32>
    %21 = arith.addf %16, %20 : vector<33x128xf32>
    %c0_25 = arith.constant 0 : index
    %c0_26 = arith.constant 0 : index
    %22 = vector.load %arg9[%c0_25, %c0_26] : memref<33x128xf32, #tpu.memory_space<vmem>>, vector<33x128xf32>
    %23 = arith.mulf %21, %22 : vector<33x128xf32>
    %cst_27 = arith.constant dense<0.000000e+00> : vector<128xf32>
    %24 = vector.multi_reduction <add>, %23, %cst_27 [0] : vector<33x128xf32> to vector<128xf32>
    %25 = vector.shape_cast %24 : vector<128xf32> to vector<1x128xf32>
    %26 = arith.mulf %23, %21 : vector<33x128xf32>
    %cst_28 = arith.constant dense<0.000000e+00> : vector<128xf32>
    %27 = vector.multi_reduction <add>, %26, %cst_28 [0] : vector<33x128xf32> to vector<128xf32>
    %28 = vector.shape_cast %27 : vector<128xf32> to vector<1x128xf32>
    %29 = tpu.concatenate %25, %28 in 0 : vector<1x128xf32>, vector<1x128xf32> -> vector<2x128xf32>
    %c0_29 = arith.constant 0 : index
    %c0_30 = arith.constant 0 : index
    %30 = vector.load %arg7[%c0_29, %c0_30] : memref<128x8xf32, #tpu.memory_space<vmem>>, vector<128x8xf32>
    %cst_31 = arith.constant dense<0.000000e+00> : vector<2x8xf32>
    %31 = tpu.matmul %29, %30, %cst_31 {dimension_numbers = #tpu.dot_dimension_numbers<[1], [0], [0], [1], [0, 0, 1, 1], [], []>} : vector<2x128xf32>, vector<128x8xf32>, vector<2x8xf32> -> vector<2x8xf32>
    %32 = vector.extract_strided_slice %31 {offsets = [0, 0], sizes = [1, 8], strides = [1, 1]} : vector<2x8xf32> to vector<1x8xf32>
    %cst_32 = arith.constant 0.001953125 : f32
    %33 = vector.broadcast %cst_32 : f32 to vector<1x8xf32>
    %34 = arith.mulf %32, %33 : vector<1x8xf32>
    %35 = vector.extract_strided_slice %31 {offsets = [1, 0], sizes = [1, 8], strides = [1, 1]} : vector<2x8xf32> to vector<1x8xf32>
    %cst_33 = arith.constant 0.001953125 : f32
    %36 = vector.broadcast %cst_33 : f32 to vector<1x8xf32>
    %37 = arith.mulf %35, %36 : vector<1x8xf32>
    %38 = arith.mulf %34, %34 : vector<1x8xf32>
    %39 = arith.subf %37, %38 : vector<1x8xf32>
    %c0_34 = arith.constant 0 : index
    %c0_35 = arith.constant 0 : index
    %40 = vector.load %arg3[%c0_34, %c0_35] : memref<1x8xf32, #tpu.memory_space<vmem>>, vector<1x8xf32>
    %cst_36 = arith.constant 9.99999974E-6 : f32
    %41 = vector.broadcast %cst_36 : f32 to vector<1x8xf32>
    %42 = arith.addf %39, %41 : vector<1x8xf32>
    %43 = math.rsqrt %42 : vector<1x8xf32>
    %44 = arith.mulf %40, %43 : vector<1x8xf32>
    %c0_37 = arith.constant 0 : index
    %c0_38 = arith.constant 0 : index
    %45 = vector.load %arg4[%c0_37, %c0_38] : memref<1x8xf32, #tpu.memory_space<vmem>>, vector<1x8xf32>
    %46 = arith.mulf %34, %44 : vector<1x8xf32>
    %47 = arith.subf %45, %46 : vector<1x8xf32>
    %48 = tpu.concatenate %44, %47 in 0 : vector<1x8xf32>, vector<1x8xf32> -> vector<2x8xf32>
    %c0_39 = arith.constant 0 : index
    %c0_40 = arith.constant 0 : index
    %49 = vector.load %arg8[%c0_39, %c0_40] : memref<8x128xf32, #tpu.memory_space<vmem>>, vector<8x128xf32>
    %cst_41 = arith.constant dense<0.000000e+00> : vector<2x128xf32>
    %50 = tpu.matmul %48, %49, %cst_41 {dimension_numbers = #tpu.dot_dimension_numbers<[1], [0], [0], [1], [0, 0, 1, 1], [], []>} : vector<2x8xf32>, vector<8x128xf32>, vector<2x128xf32> -> vector<2x128xf32>
    %51 = vector.extract_strided_slice %50 {offsets = [0, 0], sizes = [1, 128], strides = [1, 1]} : vector<2x128xf32> to vector<1x128xf32>
    %52 = vector.broadcast %51 : vector<1x128xf32> to vector<33x128xf32>
    %53 = arith.mulf %21, %52 : vector<33x128xf32>
    %54 = vector.extract_strided_slice %50 {offsets = [1, 0], sizes = [1, 128], strides = [1, 1]} : vector<2x128xf32> to vector<1x128xf32>
    %55 = vector.broadcast %54 : vector<1x128xf32> to vector<33x128xf32>
    %56 = arith.addf %53, %55 : vector<33x128xf32>
    %cst_42 = arith.constant 0.000000e+00 : f32
    %57 = vector.broadcast %cst_42 : f32 to vector<33x128xf32>
    %58 = arith.maximumf %56, %57 : vector<33x128xf32>
    %59 = vector.extract_strided_slice %58 {offsets = [0, 0], sizes = [16, 128], strides = [1, 1]} : vector<33x128xf32> to vector<16x128xf32>
    %c1_43 = arith.constant 1 : index
    %c0_44 = arith.constant 0 : index
    %60 = vector.load %arg11[%c1_43, %c0_44] : memref<40x128xf32, #tpu.memory_space<vmem>>, vector<16x128xf32>
    tpu.vector_store %arg11[%c1_43, %c0_44], %59 {strides = array<i32>} : memref<40x128xf32, #tpu.memory_space<vmem>>, vector<16x128xf32>,
    %61 = vector.extract_strided_slice %58 {offsets = [17, 0], sizes = [16, 128], strides = [1, 1]} : vector<33x128xf32> to vector<16x128xf32>
    %c18_45 = arith.constant 18 : index
    %c0_46 = arith.constant 0 : index
    %62 = vector.load %arg11[%c18_45, %c0_46] : memref<40x128xf32, #tpu.memory_space<vmem>>, vector<16x128xf32>
    tpu.vector_store %arg11[%c18_45, %c0_46], %61 {strides = array<i32>} : memref<40x128xf32, #tpu.memory_space<vmem>>, vector<16x128xf32>,
    %c0_47 = arith.constant 0 : index
    %c0_48 = arith.constant 0 : index
    %63 = vector.load %arg11[%c0_47, %c0_48] : memref<40x128xf32, #tpu.memory_space<vmem>>, vector<33x128xf32>
    %c0_49 = arith.constant 0 : index
    %c0_50 = arith.constant 0 : index
    %c0_51 = arith.constant 0 : index
    %64 = vector.load %arg2[%c0_49, %c0_50, %c0_51] : memref<3x128x128xf32, #tpu.memory_space<vmem>>, vector<1x128x128xf32>
    %65 = vector.shape_cast %64 : vector<1x128x128xf32> to vector<128x128xf32>
    %cst_52 = arith.constant dense<0.000000e+00> : vector<33x128xf32>
    %66 = tpu.matmul %63, %65, %cst_52 {dimension_numbers = #tpu.dot_dimension_numbers<[1], [0], [0], [1], [0, 0, 1, 1], [], []>} : vector<33x128xf32>, vector<128x128xf32>, vector<33x128xf32> -> vector<33x128xf32>
    %c1_53 = arith.constant 1 : index
    %c0_54 = arith.constant 0 : index
    %67 = vector.load %arg11[%c1_53, %c0_54] : memref<40x128xf32, #tpu.memory_space<vmem>>, vector<33x128xf32>
    %c1_55 = arith.constant 1 : index
    %c0_56 = arith.constant 0 : index
    %c0_57 = arith.constant 0 : index
    %68 = vector.load %arg2[%c1_55, %c0_56, %c0_57] : memref<3x128x128xf32, #tpu.memory_space<vmem>>, vector<1x128x128xf32>
    %69 = vector.shape_cast %68 : vector<1x128x128xf32> to vector<128x128xf32>
    %cst_58 = arith.constant dense<0.000000e+00> : vector<33x128xf32>
    %70 = tpu.matmul %67, %69, %cst_58 {dimension_numbers = #tpu.dot_dimension_numbers<[1], [0], [0], [1], [0, 0, 1, 1], [], []>} : vector<33x128xf32>, vector<128x128xf32>, vector<33x128xf32> -> vector<33x128xf32>
    %71 = arith.addf %66, %70 : vector<33x128xf32>
    %c2_59 = arith.constant 2 : index
    %c0_60 = arith.constant 0 : index
    %72 = vector.load %arg11[%c2_59, %c0_60] : memref<40x128xf32, #tpu.memory_space<vmem>>, vector<33x128xf32>
    %c2_61 = arith.constant 2 : index
    %c0_62 = arith.constant 0 : index
    %c0_63 = arith.constant 0 : index
    %73 = vector.load %arg2[%c2_61, %c0_62, %c0_63] : memref<3x128x128xf32, #tpu.memory_space<vmem>>, vector<1x128x128xf32>
    %74 = vector.shape_cast %73 : vector<1x128x128xf32> to vector<128x128xf32>
    %cst_64 = arith.constant dense<0.000000e+00> : vector<33x128xf32>
    %75 = tpu.matmul %72, %74, %cst_64 {dimension_numbers = #tpu.dot_dimension_numbers<[1], [0], [0], [1], [0, 0, 1, 1], [], []>} : vector<33x128xf32>, vector<128x128xf32>, vector<33x128xf32> -> vector<33x128xf32>
    %76 = arith.addf %71, %75 : vector<33x128xf32>
    %c0_65 = arith.constant 0 : index
    %c0_66 = arith.constant 0 : index
    %77 = vector.load %arg9[%c0_65, %c0_66] : memref<33x128xf32, #tpu.memory_space<vmem>>, vector<33x128xf32>
    %78 = arith.mulf %76, %77 : vector<33x128xf32>
    %cst_67 = arith.constant dense<0.000000e+00> : vector<128xf32>
    %79 = vector.multi_reduction <add>, %78, %cst_67 [0] : vector<33x128xf32> to vector<128xf32>
    %80 = vector.shape_cast %79 : vector<128xf32> to vector<1x128xf32>
    %81 = arith.mulf %78, %76 : vector<33x128xf32>
    %cst_68 = arith.constant dense<0.000000e+00> : vector<128xf32>
    %82 = vector.multi_reduction <add>, %81, %cst_68 [0] : vector<33x128xf32> to vector<128xf32>
    %83 = vector.shape_cast %82 : vector<128xf32> to vector<1x128xf32>
    %84 = tpu.concatenate %80, %83 in 0 : vector<1x128xf32>, vector<1x128xf32> -> vector<2x128xf32>
    %c0_69 = arith.constant 0 : index
    %c0_70 = arith.constant 0 : index
    %85 = vector.load %arg7[%c0_69, %c0_70] : memref<128x8xf32, #tpu.memory_space<vmem>>, vector<128x8xf32>
    %cst_71 = arith.constant dense<0.000000e+00> : vector<2x8xf32>
    %86 = tpu.matmul %84, %85, %cst_71 {dimension_numbers = #tpu.dot_dimension_numbers<[1], [0], [0], [1], [0, 0, 1, 1], [], []>} : vector<2x128xf32>, vector<128x8xf32>, vector<2x8xf32> -> vector<2x8xf32>
    %87 = vector.extract_strided_slice %86 {offsets = [0, 0], sizes = [1, 8], strides = [1, 1]} : vector<2x8xf32> to vector<1x8xf32>
    %cst_72 = arith.constant 0.001953125 : f32
    %88 = vector.broadcast %cst_72 : f32 to vector<1x8xf32>
    %89 = arith.mulf %87, %88 : vector<1x8xf32>
    %90 = vector.extract_strided_slice %86 {offsets = [1, 0], sizes = [1, 8], strides = [1, 1]} : vector<2x8xf32> to vector<1x8xf32>
    %cst_73 = arith.constant 0.001953125 : f32
    %91 = vector.broadcast %cst_73 : f32 to vector<1x8xf32>
    %92 = arith.mulf %90, %91 : vector<1x8xf32>
    %93 = arith.mulf %89, %89 : vector<1x8xf32>
    %94 = arith.subf %92, %93 : vector<1x8xf32>
    %c0_74 = arith.constant 0 : index
    %c0_75 = arith.constant 0 : index
    %95 = vector.load %arg5[%c0_74, %c0_75] : memref<1x8xf32, #tpu.memory_space<vmem>>, vector<1x8xf32>
    %cst_76 = arith.constant 9.99999974E-6 : f32
    %96 = vector.broadcast %cst_76 : f32 to vector<1x8xf32>
    %97 = arith.addf %94, %96 : vector<1x8xf32>
    %98 = math.rsqrt %97 : vector<1x8xf32>
    %99 = arith.mulf %95, %98 : vector<1x8xf32>
    %c0_77 = arith.constant 0 : index
    %c0_78 = arith.constant 0 : index
    %100 = vector.load %arg6[%c0_77, %c0_78] : memref<1x8xf32, #tpu.memory_space<vmem>>, vector<1x8xf32>
    %101 = arith.mulf %89, %99 : vector<1x8xf32>
    %102 = arith.subf %100, %101 : vector<1x8xf32>
    %103 = tpu.concatenate %99, %102 in 0 : vector<1x8xf32>, vector<1x8xf32> -> vector<2x8xf32>
    %c0_79 = arith.constant 0 : index
    %c0_80 = arith.constant 0 : index
    %104 = vector.load %arg8[%c0_79, %c0_80] : memref<8x128xf32, #tpu.memory_space<vmem>>, vector<8x128xf32>
    %cst_81 = arith.constant dense<0.000000e+00> : vector<2x128xf32>
    %105 = tpu.matmul %103, %104, %cst_81 {dimension_numbers = #tpu.dot_dimension_numbers<[1], [0], [0], [1], [0, 0, 1, 1], [], []>} : vector<2x8xf32>, vector<8x128xf32>, vector<2x128xf32> -> vector<2x128xf32>
    %106 = vector.extract_strided_slice %105 {offsets = [0, 0], sizes = [1, 128], strides = [1, 1]} : vector<2x128xf32> to vector<1x128xf32>
    %107 = vector.broadcast %106 : vector<1x128xf32> to vector<33x128xf32>
    %108 = arith.mulf %76, %107 : vector<33x128xf32>
    %109 = vector.extract_strided_slice %105 {offsets = [1, 0], sizes = [1, 128], strides = [1, 1]} : vector<2x128xf32> to vector<1x128xf32>
    %110 = vector.broadcast %109 : vector<1x128xf32> to vector<33x128xf32>
    %111 = arith.addf %108, %110 : vector<33x128xf32>
    %112 = vector.extract_strided_slice %111 {offsets = [0, 0], sizes = [16, 128], strides = [1, 1]} : vector<33x128xf32> to vector<16x128xf32>
    %c0_82 = arith.constant 0 : index
    %c0_83 = arith.constant 0 : index
    %113 = vector.load %arg0[%c0_82, %c0_83] : memref<32x128xf32, #tpu.memory_space<vmem>>, vector<16x128xf32>
    %114 = arith.addf %112, %113 : vector<16x128xf32>
    %cst_84 = arith.constant 0.000000e+00 : f32
    %115 = vector.broadcast %cst_84 : f32 to vector<16x128xf32>
    %116 = arith.maximumf %114, %115 : vector<16x128xf32>
    %c0_85 = arith.constant 0 : index
    %c0_86 = arith.constant 0 : index
    %117 = vector.load %arg10[%c0_85, %c0_86] : memref<32x128xf32, #tpu.memory_space<vmem>>, vector<16x128xf32>
    tpu.vector_store %arg10[%c0_85, %c0_86], %116 {strides = array<i32>} : memref<32x128xf32, #tpu.memory_space<vmem>>, vector<16x128xf32>,
    %118 = vector.extract_strided_slice %111 {offsets = [17, 0], sizes = [16, 128], strides = [1, 1]} : vector<33x128xf32> to vector<16x128xf32>
    %c16_87 = arith.constant 16 : index
    %c0_88 = arith.constant 0 : index
    %119 = vector.load %arg0[%c16_87, %c0_88] : memref<32x128xf32, #tpu.memory_space<vmem>>, vector<16x128xf32>
    %120 = arith.addf %118, %119 : vector<16x128xf32>
    %cst_89 = arith.constant 0.000000e+00 : f32
    %121 = vector.broadcast %cst_89 : f32 to vector<16x128xf32>
    %122 = arith.maximumf %120, %121 : vector<16x128xf32>
    %c16_90 = arith.constant 16 : index
    %c0_91 = arith.constant 0 : index
    %123 = vector.load %arg10[%c16_90, %c0_91] : memref<32x128xf32, #tpu.memory_space<vmem>>, vector<16x128xf32>
    tpu.vector_store %arg10[%c16_90, %c0_91], %122 {strides = array<i32>} : memref<32x128xf32, #tpu.memory_space<vmem>>, vector<16x128xf32>,
    return
  }
}

</mosaic_0001>

<bundles_post_ra>
// kernel: residual_block_forward.1
= control target key start
LH: loop header
LB: loop body
LE: loop exit
PB: predicated region body
PF: predicated region fallthrough
CT: control target
= control target key end

     0   :  { %v2107_v0 = vmov 0.0|0.0   ;;  %vm2108_vm0 = vmmov 0   ;;  %v2109_v4 = vmov 0.0   ;;  %vm399_vm1 = vcmask 1040384   ;;  %s2816_s1 = inlined_call_operand.vmem [shape: f32[3,128,128], index: 1, kind: input, shape index: {}]   ;;  %s2817_s0 = inlined_call_operand.vmem [shape: f32[32,128], index: 0, kind: input, shape index: {}]   ;;  %s2818_s7 = inlined_call_operand.vmem [shape: f32[128,8], index: 7, kind: input, shape index: {}]   ;;  %s2819_s9 = inlined_call_operand.vmem [shape: f32[33,128], index: 9, kind: input, shape index: {}]   ;;  %s2820_s8 = inlined_call_operand.vmem [shape: f32[8,128], index: 8, kind: input, shape index: {}]   ;;  %s2821_s3 = inlined_call_operand.vmem [shape: f32[1,8], index: 3, kind: input, shape index: {}]   ;;  %s2822_s4 = inlined_call_operand.vmem [shape: f32[1,8], index: 4, kind: input, shape index: {}]   ;;  %s2823_s2 = inlined_call_operand.vmem [shape: f32[3,128,128], index: 2, kind: input, shape index: {}]   ;;  %s2824_s5 = inlined_call_operand.vmem [shape: f32[1,8], index: 5, kind: input, shape index: {}]   ;;  %s2825_s6 = inlined_call_operand.vmem [shape: f32[1,8], index: 6, kind: input, shape index: {}]   ;;  %s2826_s10 = inlined_call_operand.vmem [shape: f32[32,128], index: 10, kind: output, shape index: {}]  }
   0x1   :  { %1867 = vmatprep.subr.bf16.mxu0 %v2107_v0  ;;  %v1275_v1 = vld [vmem:[%s2816_s1 + $0x80] sm:$0xff]  ;;  %v1276_v2 = vld [vmem:[%s2816_s1 + $0x88] sm:$0xff]  ;;  %v1277_v3 = vld [vmem:[%s2816_s1 + $0x90] sm:$0xff]  ;;  %1537 = vmatprep.mubr.msk.f32.mxu0 %vm2108_vm0, %v2109_v4  ;;  %35 = vst [vmem:[#allocation2] sm:$0x1] %v2109_v4  ;;  %vm549_vm2 = vcmask 64512  }
   0x2   :  { %36 = vst [vmem:[#allocation2 + $0x11] sm:$0x1] %v2109_v4  ;;  %37 = vst [vmem:[#allocation2 + $0x22] sm:$0x1] %v2109_v4  ;;  %v1868_v5 = vpack.c.bf16 %v1276_v2, %v1275_v1  ;;  %v1278_v6 = vld [vmem:[%s2816_s1 + $0x98] sm:$0xff]  ;;  %1939 = vmatprep.subr.bf16.mxu1 %v2107_v0  ;;  %1678 = vmatprep.mubr.msk.f32.mxu1 %vm2108_vm0, %v2109_v4  ;;  %v1279_v8 = vld [vmem:[%s2816_s1 + $0xa0] sm:$0xff] }
   0x3   :  { %v1871_v7 = vpack.c.bf16 %v1278_v6, %v1277_v3  ;;  %v1280_v9 = vld [vmem:[%s2816_s1 + $0xa8] sm:$0xff]  ;;  %v38_v10 = vld [vmem:[%s2817_s0] sm:$0xff]  ;;  %v1281_v12 = vld [vmem:[%s2816_s1 + $0xb0] sm:$0xff] }
   0x4   :  { %1869 = vmatpush3.bf16.msra.mxu0 %v1868_v5  ;;  %40 = vst [vmem:[#allocation2 + $0x1] sm:$0xff] %v38_v10  ;;  %v1874_v11 = vpack.c.bf16 %v1280_v9, %v1279_v8  ;;  %v1282_v13 = vld [vmem:[%s2816_s1 + $0xb8] sm:$0xff]  ;;  %v39_v14 = vld [vmem:[%s2817_s0 + $0x8] sm:$0xff]  ;;  %v2210_v15 = vld [vmem:[%s2817_s0 + $0x10] sm:$0xff] }
   0x5   :  { %1870 = vmatprep.subr.bf16.mxu0 %v2107_v0  ;;  %41 = vst [vmem:[#allocation2 + $0x9] sm:$0xff] %v39_v14  ;;  %44 = vst [vmem:[#allocation2 + $0x12] sm:$0xff] %v2210_v15  ;;  %v2216_v16 = vld [vmem:[%s2817_s0 + $0x18] sm:$0xff]  ;;  %v1877_v17 = vpack.c.bf16 %v1282_v13, %v1281_v12  ;;  %v1283_v18 = vld [vmem:[%s2816_s1 + $0xc0] sm:$0xff] }
   0x6   :  { %45 = vst [vmem:[#allocation2 + $0x1a] sm:$0xff] %v2216_v16  ;;  %v1284_v19 = vld [vmem:[%s2816_s1 + $0xc8] sm:$0xff]  ;;  %v1285_v21 = vld [vmem:[%s2816_s1 + $0xd0] sm:$0xff]  ;;  %v1286_v22 = vld [vmem:[%s2816_s1 + $0xd8] sm:$0xff] }
   0x7   :  { %v1880_v20 = vpack.c.bf16 %v1284_v19, %v1283_v18  ;;  %v1883_v23 = vpack.c.bf16 %v1286_v22, %v1285_v21  ;;  %v1287_v24 = vld [vmem:[%s2816_s1 + $0xe0] sm:$0xff]  ;;  %v1288_v25 = vld [vmem:[%s2816_s1 + $0xe8] sm:$0xff]  ;;  %v1289_v27 = vld [vmem:[%s2816_s1 + $0xf0] sm:$0xff] }
   0x8   :  { %1872 = vmatpush3.bf16.msra.mxu0 %v1871_v7  ;;  %v1886_v26 = vpack.c.bf16 %v1288_v25, %v1287_v24  ;;  %v1290_v28 = vld [vmem:[%s2816_s1 + $0xf8] sm:$0xff]  ;;  %v51_v30 = vld [vmem:[%s2816_s1] sm:$0xff]  ;;  %v52_v31 = vld [vmem:[%s2816_s1 + $0x8] sm:$0xff] }
   0x9   :  { %1873 = vmatprep.subr.bf16.mxu0 %v2107_v0  ;;  %v1889_v29 = vpack.c.bf16 %v1290_v28, %v1289_v27  ;;  %v1892_v32 = vpack.c.bf16 %v52_v31, %v51_v30  ;;  %v53_v33 = vld [vmem:[%s2816_s1 + $0x10] sm:$0xff]  ;;  %v54_v34 = vld [vmem:[%s2816_s1 + $0x18] sm:$0xff]  ;;  %v55_v36 = vld [vmem:[%s2816_s1 + $0x20] sm:$0xff] }
   0xa   :  { %v1895_v35 = vpack.c.bf16 %v54_v34, %v53_v33  ;;  %v56_v37 = vld [vmem:[%s2816_s1 + $0x28] sm:$0xff]  ;;  %v57_v40 = vld [vmem:[%s2816_s1 + $0x30] sm:$0xff]  ;;  %v58_v41 = vld [vmem:[%s2816_s1 + $0x38] sm:$0xff] }
   0xb   :  { %v1898_v38 = vpack.c.bf16 %v56_v37, %v55_v36  ;;  %v1901_v42 = vpack.c.bf16 %v58_v41, %v57_v40  ;;  %v59_v44 = vld [vmem:[%s2816_s1 + $0x40] sm:$0xff]  ;;  %v60_v45 = vld [vmem:[%s2816_s1 + $0x48] sm:$0xff]  ;;  %v61_v48 = vld [vmem:[%s2816_s1 + $0x50] sm:$0xff] }
   0xc   :  { %1875 = vmatpush3.bf16.msra.mxu0 %v1874_v11  ;;  %v69_v39 = vld [vmem:[#allocation2 + $0x11] sm:$0xff]  ;;  %v1904_v46 = vpack.c.bf16 %v60_v45, %v59_v44  ;;  %v63_v51 = vld [vmem:[%s2816_s1 + $0x60] sm:$0xff]  ;;  %v64_v52 = vld [vmem:[%s2816_s1 + $0x68] sm:$0xff] }
   0xd   :  { %1876 = vmatprep.subr.bf16.mxu0 %v2107_v0  ;;  %v70_v43 = vld [vmem:[#allocation2 + $0x19] sm:$0xff]  ;;  %v71_v47 = vld [vmem:[#allocation2 + $0x21] sm:$0x1]  ;;  %v1910_v53 = vpack.c.bf16 %v64_v52, %v63_v51  ;;  %v65_v54 = vld [vmem:[%s2816_s1 + $0x70] sm:$0xff] }
   0xe   :  { %v62_v49 = vld [vmem:[%s2816_s1 + $0x58] sm:$0xff]  ;;  %v1291_v57 = vld [vmem:[%s2816_s1 + $0x100] sm:$0xff]  ;;  %v1292_v58 = vld [vmem:[%s2816_s1 + $0x108] sm:$0xff] }
   0xf   :  { %v1907_v50 = vpack.c.bf16 %v62_v49, %v61_v48  ;;  %v66_v55 = vld [vmem:[%s2816_s1 + $0x78] sm:$0xff]  ;;  %v46_v59 = vld [vmem:[#allocation2] sm:$0xff]  ;;  %v1916_v60 = vpack.c.bf16 %v1292_v58, %v1291_v57  ;;  %v1293_v61 = vld [vmem:[%s2816_s1 + $0x110] sm:$0xff] }
  0x10   :  { %1878 = vmatpush3.bf16.msra.mxu0 %v1877_v17  ;;  %v1913_v56 = vpack.c.bf16 %v66_v55, %v65_v54  ;;  %v1294_v62 = vld [vmem:[%s2816_s1 + $0x118] sm:$0xff]  ;;  %v47_v1 = vld [vmem:[#allocation2 + $0x8] sm:$0xff]  ;;  %v1295_v2 = vld [vmem:[%s2816_s1 + $0x120] sm:$0xff] }
  0x11   :  { %1879 = vmatprep.subr.bf16.mxu0 %v2107_v0  ;;  %v1919_v63 = vpack.c.bf16 %v1294_v62, %v1293_v61  ;;  %v1296_v3 = vld [vmem:[%s2816_s1 + $0x128] sm:$0xff]  ;;  %v48_v6 = vld [vmem:[#allocation2 + $0x10] sm:$0xff]  ;;  %v1298_v8 = vld [vmem:[%s2816_s1 + $0x138] sm:$0xff] }
  0x12   :  { %v1922_v5 = vpack.c.bf16 %v1296_v3, %v1295_v2  ;;  %v1297_v7 = vld [vmem:[%s2816_s1 + $0x130] sm:$0xff]  ;;  %v1299_v11 = vld [vmem:[%s2816_s1 + $0x140] sm:$0xff]  ;;  %v1300_v12 = vld [vmem:[%s2816_s1 + $0x148] sm:$0xff] }
  0x13   :  { %v1925_v9 = vpack.c.bf16 %v1298_v8, %v1297_v7  ;;  %v1928_v13 = vpack.c.bf16 %v1300_v12, %v1299_v11  ;;  %v1301_v17 = vld [vmem:[%s2816_s1 + $0x150] sm:$0xff]  ;;  %v1302_v18 = vld [vmem:[%s2816_s1 + $0x158] sm:$0xff]  ;;  %v1304_v21 = vld [vmem:[%s2816_s1 + $0x168] sm:$0xff] }
  0x14   :  { %1881 = vmatpush3.bf16.msra.mxu0 %v1880_v20  ;;  %v1931_v19 = vpack.c.bf16 %v1302_v18, %v1301_v17  ;;  %v1303_v20 = vld [vmem:[%s2816_s1 + $0x160] sm:$0xff]  ;;  %v1306_v24 = vld [vmem:[%s2816_s1 + $0x178] sm:$0xff]  ;;  %v270_v27 = vld [vmem:[#allocation2 + $0xa] sm:$0xff] }
  0x15   :  { %1882 = vmatprep.subr.bf16.mxu0 %v2107_v0  ;;  %v1934_v22 = vpack.c.bf16 %v1304_v21, %v1303_v20  ;;  %v273_v28 = vld [vmem:[#allocation2 + $0x22] sm:$0x1]  ;;  %v428_v31 = vld [vmem:[%s2818_s7 + $0x18] sm:$0xff]  ;;  %v430_v34 = vld [vmem:[%s2818_s7 + $0x28] sm:$0xff] }
  0x16   :  { %v429_v33 = vld [vmem:[%s2818_s7 + $0x20] sm:$0xff]  ;;  %v431_v36 = vld [vmem:[%s2818_s7 + $0x30] sm:$0xff]  ;;  %v432_v37 = vld [vmem:[%s2818_s7 + $0x38] sm:$0xff] }
  0x17   :  { %v434_v40 = vld [vmem:[%s2818_s7 + $0x48] sm:$0xff]  ;;  %v437_v45 = vld [vmem:[%s2818_s7 + $0x60] sm:$0xff]  ;;  %v439_v48 = vld [vmem:[%s2818_s7 + $0x70] sm:$0xff] }
  0x18   :  { %1884 = vmatpush3.bf16.msra.mxu0 %v1883_v23  ;;  %v1305_v23 = vld [vmem:[%s2816_s1 + $0x170] sm:$0xff]  ;;  %v440_v49 = vld [vmem:[%s2818_s7 + $0x78] sm:$0xff]  ;;  %v2462_v52 = vld [vmem:[%s2819_s9] sm:$0xff] }
  0x19   :  { %1885 = vmatprep.subr.bf16.mxu0 %v2107_v0  ;;  %v1937_v25 = vpack.c.bf16 %v1306_v24, %v1305_v23  ;;  %v2467_v54 = vld [vmem:[%s2819_s9 + $0x8] sm:$0xff]  ;;  %v390_v12 = vld [vmem:[%s2819_s9 + $0x20] sm:$0x1] }
  0x1c   :  { %1887 = vmatpush3.bf16.msra.mxu0 %v1886_v26  ;;  %v269_v26 = vld [vmem:[#allocation2 + $0x2] sm:$0xff] }
  0x1d   :  { %1888 = vmatprep.subr.bf16.mxu0 %v2107_v0 }
  0x20   :  { %1890 = vmatpush3.bf16.msra.mxu0 %v1889_v29  ;;  %v425_v29 = vld [vmem:[%s2818_s7] sm:$0xff] }
  0x21   :  { %1891 = vmatprep.subr.bf16.mxu0 %v2107_v0 }
  0x23   :  { %1538 = vmatmul.mubr.f32.vlgmr.msra.gmra.mrb[0].mxu0 %v38_v10  ;;  %v49_v10 = vld [vmem:[#allocation2 + $0x18] sm:$0xff] }
  0x24   :  { %1893 = vmatpush3.bf16.msra.mxu0 %v1892_v32  ;;  %1540 = vmatprep.mubr.msk.f32.mxu0 %vm2108_vm0, %v2109_v4 }
  0x25   :  { %1894 = vmatprep.subr.bf16.mxu0 %v2107_v0 }
  0x27   :  { %1541 = vmatmul.mubr.f32.gmra.mrb[2].mxu0 %v39_v14  ;;  %v50_v14 = vld [vmem:[#allocation2 + $0x20] sm:$0x1] }
  0x28   :  { %1896 = vmatpush3.bf16.msra.mxu0 %v1895_v35  ;;  %1543 = vmatprep.mubr.msk.f32.mxu0 %vm2108_vm0, %v2109_v4  ;;  %v1946_v35 = vpack.c.bf16 %v430_v34, %v429_v33 }
  0x29   :  { %1897 = vmatprep.subr.bf16.mxu0 %v2107_v0 }
  0x2b   :  { %1544 = vmatmul.mubr.f32.gmra.mrb[4].mxu0 %v69_v39  ;;  %v433_v39 = vld [vmem:[%s2818_s7 + $0x40] sm:$0xff] }
  0x2c   :  { %1899 = vmatpush3.bf16.msra.mxu0 %v1898_v38  ;;  %1546 = vmatprep.mubr.msk.f32.mxu0 %vm2108_vm0, %v2109_v4  ;;  %v1949_v38 = vpack.c.bf16 %v432_v37, %v431_v36  ;;  %v1952_v41 = vpack.c.bf16 %v434_v40, %v433_v39  ;;  %v2512_v37 = vld [vmem:[%s2820_s8] sm:$0xff] }
  0x2d   :  { %1900 = vmatprep.subr.bf16.mxu0 %v2107_v0 }
  0x2f   :  { %1547 = vmatmul.mubr.f32.gmra.mrb[6].mxu0 %v70_v43  ;;  %v436_v43 = vld [vmem:[%s2818_s7 + $0x58] sm:$0xff] }
  0x30   :  { %1902 = vmatpush3.bf16.msra.mxu0 %v1901_v42  ;;  %1549 = vmatprep.mubr.msk.f32.mxu0 %vm2108_vm0, %v2109_v4  ;;  %v435_v42 = vld [vmem:[%s2818_s7 + $0x50] sm:$0xff] }
  0x31   :  { %1903 = vmatprep.subr.bf16.mxu0 %v2107_v0  ;;  %v1955_v44 = vpack.c.bf16 %v436_v43, %v435_v42 }
  0x33   :  { %1550 = vmatmul.mubr.f32.gmra.mrb[8].mxu0 %v71_v47 }
  0x34   :  { %1905 = vmatpush3.bf16.msra.mxu0 %v1904_v46  ;;  %1584 = vmatprep.mubr.msk.f32.mxu0 %vm2108_vm0, %v2109_v4  ;;  %v438_v46 = vld [vmem:[%s2818_s7 + $0x68] sm:$0xff] }
  0x35   :  { %1906 = vmatprep.subr.bf16.mxu0 %v2107_v0  ;;  %v1958_v47 = vpack.c.bf16 %v438_v46, %v437_v45  ;;  %v2110_v45 = vmov 1966171168  }
  0x36   :  { %v522_v46 = vunpack.c.l.s4 %v2110_v45  ;;  %v657_v45 = vld [vmem:[%s2823_s2 + $0x8] sm:$0xff] }
  0x38   :  { %1908 = vmatpush3.bf16.msra.mxu0 %v1907_v50  ;;  %v1961_v50 = vpack.c.bf16 %v440_v49, %v439_v48  ;;  %v523_v48 = vunpack.c.0.s8 %v522_v46 }
  0x39   :  { %1909 = vmatprep.subr.bf16.mxu0 %v2107_v0 }
  0x3c   :  { %1911 = vmatpush3.bf16.msra.mxu0 %v1910_v53 }
  0x3d   :  { %1912 = vmatprep.subr.bf16.mxu0 %v2107_v0 }
  0x40   :  { %1914 = vmatpush3.bf16.msra.mxu0 %v1913_v56 }
  0x41   :  { %1915 = vmatprep.subr.bf16.mxu0 %v2107_v0 }
  0x43   :  { %1585 = vmatmul.mubr.f32.vlgmr.msra.gmra.mrb[0].mxu0 %v46_v59  ;;  %v2478_v59 = vld [vmem:[%s2819_s9 + $0x10] sm:$0xff] }
  0x44   :  { %1917 = vmatpush3.bf16.msra.mxu0 %v1916_v60  ;;  %1587 = vmatprep.mubr.msk.f32.mxu0 %vm2108_vm0, %v2109_v4 }
  0x45   :  { %1918 = vmatprep.subr.bf16.mxu0 %v2107_v0 }
  0x47   :  { %1588 = vmatmul.mubr.f32.gmra.mrb[2].mxu0 %v47_v1 }
  0x48   :  { %1920 = vmatpush3.bf16.msra.mxu0 %v1919_v63  ;;  %1590 = vmatprep.mubr.msk.f32.mxu0 %vm2108_vm0, %v2109_v4 }
  0x49   :  { %1921 = vmatprep.subr.bf16.mxu0 %v2107_v0 }
  0x4b   :  { %1591 = vmatmul.mubr.f32.gmra.mrb[4].mxu0 %v48_v6 }
  0x4c   :  { %1923 = vmatpush3.bf16.msra.mxu0 %v1922_v5  ;;  %1593 = vmatprep.mubr.msk.f32.mxu0 %vm2108_vm0, %v2109_v4  ;;  %v2489_v5 = vld [vmem:[%s2819_s9 + $0x18] sm:$0xff] }
  0x4d   :  { %1924 = vmatprep.subr.bf16.mxu0 %v2107_v0 }
  0x4f   :  { %1594 = vmatmul.mubr.f32.gmra.mrb[6].mxu0 %v49_v10 }
  0x50   :  { %1926 = vmatpush3.bf16.msra.mxu0 %v1925_v9  ;;  %1596 = vmatprep.mubr.msk.f32.mxu0 %vm2108_vm0, %v2109_v4 }
  0x51   :  { %1927 = vmatprep.subr.bf16.mxu0 %v2107_v0 }
  0x53   :  { %1597 = vmatmul.mubr.f32.gmra.mrb[8].mxu0 %v50_v14 }
  0x54   :  { %1929 = vmatpush3.bf16.msra.mxu0 %v1928_v13  ;;  %1631 = vmatprep.mubr.msk.f32.mxu0 %vm2108_vm0, %v2109_v4 }
  0x55   :  { %1930 = vmatprep.subr.bf16.mxu0 %v2107_v0 }
  0x58   :  { %1932 = vmatpush3.bf16.msra.mxu0 %v1931_v19 }
  0x59   :  { %1933 = vmatprep.subr.bf16.mxu0 %v2107_v0 }
  0x5c   :  { %1935 = vmatpush3.bf16.msra.mxu0 %v1934_v22 }
  0x5d   :  { %1936 = vmatprep.subr.bf16.mxu0 %v2107_v0 }
  0x60   :  { %1938 = vmatpush3.bf16.msra.mxu0 %v1937_v25 }
  0x61   :  { %2035 = vmatprep.subr.bf16.mxu0 %v2107_v0 }
  0x63   :  { %1632 = vmatmul.mubr.f32.vlgmr.msra.gmra.mrb[0].mxu0 %v269_v26 }
  0x64   :  { %1634 = vmatprep.mubr.msk.f32.mxu0 %vm2108_vm0, %v2109_v4 }
  0x67   :  { %1635 = vmatmul.mubr.f32.gmra.mrb[2].mxu0 %v270_v27 }
  0x68   :  { %1637 = vmatprep.mubr.msk.f32.mxu0 %vm2108_vm0, %v2109_v4 }
  0x6b   :  { %1638 = vmatmul.mubr.f32.gmra.mrb[4].mxu0 %v2210_v15  ;;  %v426_v15 = vld [vmem:[%s2818_s7 + $0x8] sm:$0xff] }
  0x6c   :  { %1640 = vmatprep.mubr.msk.f32.mxu0 %vm2108_vm0, %v2109_v4  ;;  %v1940_v30 = vpack.c.bf16 %v426_v15, %v425_v29 }
  0x6e   :  { %1941 = vmatpush3.bf16.msra.mxu1 %v1940_v30  ;;  %2037 = vmatpush3.bf16.msra.mxu0 %v1940_v30 }
  0x6f   :  { %1641 = vmatmul.mubr.f32.gmra.mrb[6].mxu0 %v2216_v16  ;;  %1942 = vmatprep.subr.bf16.mxu1 %v2107_v0  ;;  %v427_v16 = vld [vmem:[%s2818_s7 + $0x10] sm:$0xff] }
  0x70   :  { %1643 = vmatprep.mubr.msk.f32.mxu0 %vm2108_vm0, %v2109_v4  ;;  %2038 = vmatprep.subr.bf16.mxu0 %v2107_v0  ;;  %v1943_v32 = vpack.c.bf16 %v428_v31, %v427_v16 }
  0x72   :  { %1944 = vmatpush3.bf16.msra.mxu1 %v1943_v32  ;;  %2040 = vmatpush3.bf16.msra.mxu0 %v1943_v32 }
  0x73   :  { %1644 = vmatmul.mubr.f32.gmra.mrb[8].mxu0 %v273_v28  ;;  %1945 = vmatprep.subr.bf16.mxu1 %v2107_v0 }
  0x74   :  { %1859 = vmatprep.mubr.msk.f32.mxu0 %vm2108_vm0, %v2109_v4  ;;  %2041 = vmatprep.subr.bf16.mxu0 %v2107_v0 }
  0x76   :  { %1947 = vmatpush3.bf16.msra.mxu1 %v1946_v35  ;;  %2043 = vmatpush3.bf16.msra.mxu0 %v1946_v35 }
  0x77   :  { %1948 = vmatprep.subr.bf16.mxu1 %v2107_v0  ;;  %2044 = vmatprep.subr.bf16.mxu0 %v2107_v0 }
  0x7a   :  { %1950 = vmatpush3.bf16.msra.mxu1 %v1949_v38  ;;  %2046 = vmatpush3.bf16.msra.mxu0 %v1949_v38 }
  0x7b   :  { %1951 = vmatprep.subr.bf16.mxu1 %v2107_v0  ;;  %2047 = vmatprep.subr.bf16.mxu0 %v2107_v0 }
  0x7e   :  { %1953 = vmatpush3.bf16.msra.mxu1 %v1952_v41  ;;  %2049 = vmatpush3.bf16.msra.mxu0 %v1952_v41 }
  0x7f   :  { %1954 = vmatprep.subr.bf16.mxu1 %v2107_v0  ;;  %2050 = vmatprep.subr.bf16.mxu0 %v2107_v0 }
  0x82   :  { %1956 = vmatpush3.bf16.msra.mxu1 %v1955_v44  ;;  %2052 = vmatpush3.bf16.msra.mxu0 %v1955_v44 }
  0x83   :  { %1957 = vmatprep.subr.bf16.mxu1 %v2107_v0  ;;  %2053 = vmatprep.subr.bf16.mxu0 %v2107_v0 }
  0x86   :  { %1959 = vmatpush3.bf16.msra.mxu1 %v1958_v47  ;;  %2055 = vmatpush3.bf16.msra.mxu0 %v1958_v47  ;;  %v524_v47 = vlaneseq }
  0x87   :  { %1960 = vmatprep.subr.bf16.mxu1 %v2107_v0  ;;  %2056 = vmatprep.subr.bf16.mxu0 %v2107_v0 }
  0x88   :  { %v2516_v49 = vshrl.u32 %v524_v47, 7 }
  0x8a   :  { %1962 = vmatpush3.bf16.msra.mxu1 %v1961_v50  ;;  %2058 = vmatpush3.bf16.msra.mxu0 %v1961_v50  ;;  %v2519_v50 = vsub.s32 %v523_v48, %v2516_v49 }
  0x8b   :  { %1681 = vmatprep.subr.mxu1 %v2109_v4  ;;  %1862 = vmatprep.subr.mxu0 %v2109_v4 }
 0x136   :  { %v2457_v51 = vpop.f32.mrb[0].mxu0 }
 0x137   :  { %v1633_v53 = vpop.f32.mrb[1].mxu0  ;;  %v391_v55 = vmul.f32 %v2462_v52, %v2457_v51 }
 0x139   :  { %v408_v60 = vmul.f32 %v391_v55, %v2457_v51 }
 0x13a   :  { %v2471_v56 = vpop.f32.mrb[2].mxu0 }
 0x13b   :  { %v392_v57 = vmul.f32 %v2467_v54, %v2471_v56  ;;  %v1636_v58 = vpop.f32.mrb[3].mxu0 }
 0x13c   :  { %v517_v58 = vld [vmem:[%s2821_s3] sm:$0x1] }
 0x13d   :  { %v396_v61 = vadd.f32 %v392_v57, %v391_v55  ;;  %v409_v62 = vmul.f32 %v392_v57, %v2471_v56 }
 0x13e   :  { %v2482_v63 = vpop.f32.mrb[4].mxu0 }
 0x13f   :  { %v413_v1 = vadd.f32 %v409_v62, %v408_v60  ;;  %v393_v2 = vmul.f32 %v2478_v59, %v2482_v63  ;;  %v1639_v3 = vpop.f32.mrb[5].mxu0  ;;  %v538_v62 = vld [vmem:[%s2822_s4] sm:$0x1] }
 0x140   :  { %v1308_v3 = vld [vmem:[%s2823_s2 + $0x80] sm:$0xff] }
 0x141   :  { %v397_v6 = vadd.f32 %v396_v61, %v393_v2  ;;  %v410_v7 = vmul.f32 %v393_v2, %v2482_v63  ;;  %v2530_v2 = vsub.s32 0, %v2516_v49 }
 0x142   :  { %v2492_v8 = vpop.f32.mrb[6].mxu0 }
 0x143   :  { %v414_v9 = vadd.f32 %v413_v1, %v410_v7  ;;  %v394_v10 = vmul.f32 %v2489_v5, %v2492_v8  ;;  %v1642_v11 = vpop.f32.mrb[7].mxu0 }
 0x144   :  { %v1310_v11 = vld [vmem:[%s2823_s2 + $0x90] sm:$0xff] }
 0x145   :  { %v398_v13 = vadd.f32 %v397_v6, %v394_v10  ;;  %v411_v14 = vmul.f32 %v394_v10, %v2492_v8  ;;  %v1309_v6 = vld [vmem:[%s2823_s2 + $0x88] sm:$0xff] }
 0x146   :  { %v2500_v17 = vpop.f32.mrb[8].mxu0  ;;  %v1964_v10 = vpack.c.bf16 %v1309_v6, %v1308_v3  ;;  %v661_v3 = vld [vmem:[%s2823_s2 + $0x28] sm:$0xff] }
 0x147   :  { %v415_v18 = vadd.f32 %v414_v9, %v411_v14  ;;  %v395_v19 = vmul.f32 %v390_v12, %v2500_v17  ;;  %v1645_v20 = vpop.f32.mrb[9].mxu0  ;;  %v1311_v12 = vld [vmem:[%s2823_s2 + $0x98] sm:$0xff] }
 0x148   :  { %v1967_v14 = vpack.c.bf16 %v1311_v12, %v1310_v11  ;;  %v664_v12 = vld [vmem:[%s2823_s2 + $0x40] sm:$0xff] }
 0x149   :  { %v400_v21 = vsel %vm399_vm1, %v395_v19, 0.0  ;;  %v412_v22 = vmul.f32 %v395_v19, %v2500_v17  ;;  %v1313_v19 = vld [vmem:[%s2823_s2 + $0xa8] sm:$0xff] }
 0x14a   :  { %v401_v23 = vadd.f32 %v400_v21, %v398_v13  ;;  %v1314_v21 = vld [vmem:[%s2823_s2 + $0xb0] sm:$0xff] }
 0x14b   :  { %v416_v24 = vsel %vm399_vm1, %v412_v22, 0.0  ;;  %v1315_v22 = vld [vmem:[%s2823_s2 + $0xb8] sm:$0xff] }
 0x14c   :  { %v402_v25 = vrot.slane %v401_v23, 4  ;;  %v417_v26 = vadd.f32 %v416_v24, %v415_v18  ;;  %v1312_v18 = vld [vmem:[%s2823_s2 + $0xa0] sm:$0xff] }
 0x14d   :  { %v1970_v20 = vpack.c.bf16 %v1313_v19, %v1312_v18  ;;  %v1316_v24 = vld [vmem:[%s2823_s2 + $0xc0] sm:$0xff]  ;;  %v666_v18 = vld [vmem:[%s2823_s2 + $0x50] sm:$0xff]  ;;  %v667_v19 = vld [vmem:[%s2823_s2 + $0x58] sm:$0xff] }
 0x14e   :  { %v403_v27 = vadd.f32 %v402_v25, %v401_v23  ;;  %v418_v28 = vrot.slane %v417_v26, 4  ;;  %v1973_v23 = vpack.c.bf16 %v1315_v22, %v1314_v21  ;;  %v1317_v25 = vld [vmem:[%s2823_s2 + $0xc8] sm:$0xff]  ;;  %v2003_v21 = vpack.c.bf16 %v667_v19, %v666_v18  ;;  %v668_v22 = vld [vmem:[%s2823_s2 + $0x60] sm:$0xff] }
 0x150   :  { %v419_v29 = vadd.f32 %v418_v28, %v417_v26  ;;  %v404_v15 = vrot.slane %v403_v27, 2  ;;  %v1976_v26 = vpack.c.bf16 %v1317_v25, %v1316_v24  ;;  %v1319_v28 = vld [vmem:[%s2823_s2 + $0xd8] sm:$0xff]  ;;  %v670_v25 = vld [vmem:[%s2823_s2 + $0x70] sm:$0xff] }
 0x152   :  { %v405_v30 = vadd.f32 %v404_v15, %v403_v27  ;;  %v420_v16 = vrot.slane %v419_v29, 2  ;;  %v1318_v27 = vld [vmem:[%s2823_s2 + $0xd0] sm:$0xff]  ;;  %v1320_v15 = vld [vmem:[%s2823_s2 + $0xe0] sm:$0xff] }
 0x154   :  { %v406_v31 = vrot.slane %v405_v30, 1  ;;  %v421_v32 = vadd.f32 %v420_v16, %v419_v29  ;;  %v1979_v29 = vpack.c.bf16 %v1319_v28, %v1318_v27  ;;  %v1324_v28 = vld [vmem:[%s2823_s2 + $0x100] sm:$0xff] }
 0x156   :  { %v422_v33 = vrot.slane %v421_v32, 1  ;;  %v407_v34 = vadd.f32 %v406_v31, %v405_v30  ;;  %v1321_v30 = vld [vmem:[%s2823_s2 + $0xe8] sm:$0xff]  ;;  %v1322_v31 = vld [vmem:[%s2823_s2 + $0xf0] sm:$0xff] }
 0x157   :  { %v1982_v16 = vpack.c.bf16 %v1321_v30, %v1320_v15  ;;  %v1326_v30 = vld [vmem:[%s2823_s2 + $0x110] sm:$0xff] }
 0x158   :  { %v423_v35 = vadd.f32 %v422_v33, %v421_v32  ;;  %v1323_v32 = vld [vmem:[%s2823_s2 + $0xf8] sm:$0xff] }
 0x159   :  { %v1985_v33 = vpack.c.bf16 %v1323_v32, %v1322_v31 }
 0x15a   :  { %v424_v36 = vsel %vm399_vm1, %v407_v34, %v423_v35  ;;  %v634_v34 = vsub.s32 1, %v2516_v49 }
 0x15b   :  { %1679 = vmatmul.mubr.f32.vlgmr.msra.gmra.mrb[0].mxu1 %v424_v36 }
 0x15c   :  { %1683 = vmatprep.mubr.msk.f32.mxu1 %vm2108_vm0, %v2109_v4  ;;  %1682 = vmatpush3.msra.mxu1 %v2512_v37 }
 0x15d   :  { %1963 = vmatprep.subr.bf16.mxu1 %v2107_v0 }
 0x22e   :  { %v507_v38 = vpop.f32.mrb[0].mxu1 }
 0x22f   :  { %v511_v39 = vmul.f32 0.001953125, %v507_v38  ;;  %v1680_v40 = vpop.f32.mrb[1].mxu1 }
 0x231   :  { %v512_v41 = vmul.f32 %v511_v39, %v511_v39 }
 0x233   :  { %v514_v42 = vrot.slane %v512_v41, 7 }
 0x235   :  { %v516_v43 = vsub.f32 %v511_v39, %v514_v42 }
 0x237   :  { %v518_v44 = vadd.f32 1e-05, %v516_v43 }
 0x239   :  { %2103 = vrsqrt.f32 %v518_v44  ;;  %v656_v44 = vld [vmem:[%s2823_s2] sm:$0xff] }
 0x243   :  { %v2104_v53 = vpop.eup %2103 }
 0x244   :  { %v527_v55 = vrot.slane %v2104_v53, %v2519_v50 }
 0x246   :  { %v528_v57 = vcombine.high %v527_v55, %v527_v55 }
 0x248   :  { %v535_v60 = vrot.slane %v528_v57, %v2519_v50 }
 0x24a   :  { %v537_v61 = vmul.f32 %v535_v60, %v517_v58  ;;  %v658_v60 = vld [vmem:[%s2823_s2 + $0x10] sm:$0xff] }
 0x24c   :  { %v539_v1 = vmul.f32 %v537_v61, %v511_v39 }
 0x24e   :  { %v540_v7 = vsub.f32 %v538_v62, %v539_v1  ;;  %v660_v1 = vld [vmem:[%s2823_s2 + $0x20] sm:$0xff] }
 0x24f   :  { %v1994_v6 = vpack.c.bf16 %v661_v3, %v660_v1 }
 0x250   :  { %v545_v9 = vrot.slane %v540_v7, %v2530_v2  ;;  %v662_v7 = vld [vmem:[%s2823_s2 + $0x30] sm:$0xff] }
 0x252   :  { %v547_v13 = vsel %vm399_vm1, %v537_v61, %v545_v9  ;;  %v659_v61 = vld [vmem:[%s2823_s2 + $0x18] sm:$0xff] }
 0x253   :  { %1684 = vmatmul.mubr.msk.f32.vlgmr.msra.gmra.mrb[2].mxu1 %vm549_vm2, %v547_v13  ;;  %v663_v9 = vld [vmem:[%s2823_s2 + $0x38] sm:$0xff]  ;;  %v665_v13 = vld [vmem:[%s2823_s2 + $0x48] sm:$0xff] }
 0x254   :  { %1965 = vmatpush3.bf16.msra.mxu1 %v1964_v10  ;;  %1718 = vmatprep.mubr.msk.f32.mxu1 %vm2108_vm0, %v2109_v4  ;;  %v1997_v11 = vpack.c.bf16 %v663_v9, %v662_v7 }
 0x255   :  { %1966 = vmatprep.subr.bf16.mxu1 %v2107_v0 }
 0x258   :  { %1968 = vmatpush3.bf16.msra.mxu1 %v1967_v14  ;;  %v2000_v14 = vpack.c.bf16 %v665_v13, %v664_v12 }
 0x259   :  { %1969 = vmatprep.subr.bf16.mxu1 %v2107_v0 }
 0x25c   :  { %1971 = vmatpush3.bf16.msra.mxu1 %v1970_v20 }
 0x25d   :  { %1972 = vmatprep.subr.bf16.mxu1 %v2107_v0 }
 0x260   :  { %1974 = vmatpush3.bf16.msra.mxu1 %v1973_v23  ;;  %v669_v23 = vld [vmem:[%s2823_s2 + $0x68] sm:$0xff] }
 0x261   :  { %1975 = vmatprep.subr.bf16.mxu1 %v2107_v0  ;;  %v2006_v24 = vpack.c.bf16 %v669_v23, %v668_v22 }
 0x264   :  { %1977 = vmatpush3.bf16.msra.mxu1 %v1976_v26  ;;  %v671_v26 = vld [vmem:[%s2823_s2 + $0x78] sm:$0xff] }
 0x265   :  { %1978 = vmatprep.subr.bf16.mxu1 %v2107_v0  ;;  %v2009_v27 = vpack.c.bf16 %v671_v26, %v670_v25  ;;  %v995_v25 = vld [vmem:[%s2819_s9 + $0x20] sm:$0x1] }
 0x268   :  { %1980 = vmatpush3.bf16.msra.mxu1 %v1979_v29  ;;  %v1325_v29 = vld [vmem:[%s2823_s2 + $0x108] sm:$0xff] }
 0x269   :  { %1981 = vmatprep.subr.bf16.mxu1 %v2107_v0  ;;  %v2012_v15 = vpack.c.bf16 %v1325_v29, %v1324_v28 }
 0x26c   :  { %1983 = vmatpush3.bf16.msra.mxu1 %v1982_v16  ;;  %v1327_v16 = vld [vmem:[%s2823_s2 + $0x118] sm:$0xff] }
 0x26d   :  { %1984 = vmatprep.subr.bf16.mxu1 %v2107_v0  ;;  %v2015_v32 = vpack.c.bf16 %v1327_v16, %v1326_v30 }
 0x270   :  { %1986 = vmatpush3.bf16.msra.mxu1 %v1985_v33  ;;  %v1328_v33 = vld [vmem:[%s2823_s2 + $0x120] sm:$0xff] }
 0x271   :  { %1987 = vmatprep.subr.bf16.mxu1 %v2107_v0 }
 0x326   :  { %v619_v35 = vpop.f32.mrb[2].mxu1 }
 0x327   :  { %v626_v36 = vrot.slane %v619_v35, %v2530_v2  ;;  %v1685_v38 = vpop.f32.mrb[3].mxu1  ;;  %v635_v39 = vrot.slane %v619_v35, %v634_v34  ;;  %v1329_v35 = vld [vmem:[%s2823_s2 + $0x128] sm:$0xff] }
 0x328   :  { %v2018_v38 = vpack.c.bf16 %v1329_v35, %v1328_v33 }
 0x329   :  { %v627_v40 = vmul.f32 %v626_v36, %v2457_v51  ;;  %v628_v41 = vmul.f32 %v626_v36, %v2471_v56  ;;  %v629_v42 = vmul.f32 %v626_v36, %v2482_v63  ;;  %v630_v43 = vmul.f32 %v626_v36, %v2492_v8 }
 0x32a   :  { %v631_v46 = vmul.f32 %v626_v36, %v2500_v17  ;;  %v1988_v56 = vpack.c.bf16 %v657_v45, %v656_v44  ;;  %v1991_v17 = vpack.c.bf16 %v659_v61, %v658_v60  ;;  %v1333_v44 = vld [vmem:[%s2823_s2 + $0x148] sm:$0xff] }
 0x32b   :  { %v636_v47 = vadd.f32 %v635_v39, %v627_v40  ;;  %v637_v48 = vadd.f32 %v635_v39, %v628_v41  ;;  %v638_v53 = vadd.f32 %v635_v39, %v629_v42  ;;  %v639_v51 = vadd.f32 %v635_v39, %v630_v43  ;;  %v1331_v40 = vld [vmem:[%s2823_s2 + $0x138] sm:$0xff]  ;;  %v1332_v43 = vld [vmem:[%s2823_s2 + $0x140] sm:$0xff] }
 0x32c   :  { %v640_v55 = vadd.f32 %v635_v39, %v631_v46  ;;  %v1330_v39 = vld [vmem:[%s2823_s2 + $0x130] sm:$0xff]  ;;  %v2024_v46 = vpack.c.bf16 %v1333_v44, %v1332_v43 }
 0x32d   :  { %v641_v57 = vmax.f32 %v636_v47, 0.0  ;;  %v642_v63 = vmax.f32 %v637_v48, 0.0  ;;  %v643_v58 = vmax.f32 %v638_v53, 0.0  ;;  %v644_v8 = vmax.f32 %v639_v51, 0.0  ;;  %v1334_v47 = vld [vmem:[%s2823_s2 + $0x150] sm:$0xff]  ;;  %v1335_v48 = vld [vmem:[%s2823_s2 + $0x158] sm:$0xff] }
 0x32e   :  { %v645_v62 = vmax.f32 %v640_v55, 0.0  ;;  %v2021_v42 = vpack.c.bf16 %v1331_v40, %v1330_v39  ;;  %v2027_v51 = vpack.c.bf16 %v1335_v48, %v1334_v47  ;;  %v1336_v55 = vld [vmem:[%s2823_s2 + $0x160] sm:$0xff] }
 0x32f   :  { %646 = vst [vmem:[#allocation2 + $0x1] sm:$0xff] %v641_v57  ;;  %648 = vst [vmem:[#allocation2 + $0x11] sm:$0xfe] %v643_v58  ;;  %1719 = vmatmul.mubr.f32.vlgmr.msra.gmra.mrb[4].mxu1 %v641_v57  ;;  %v1339_v58 = vld [vmem:[%s2823_s2 + $0x178] sm:$0xff] }
 0x330   :  { %647 = vst [vmem:[#allocation2 + $0x9] sm:$0xff] %v642_v63  ;;  %649 = vst [vmem:[#allocation2 + $0x19] sm:$0xff] %v644_v8  ;;  %1989 = vmatpush3.bf16.msra.mxu1 %v1988_v56  ;;  %1721 = vmatprep.mubr.msk.f32.mxu1 %vm2108_vm0, %v2109_v4  ;;  %v1337_v56 = vld [vmem:[%s2823_s2 + $0x168] sm:$0xff] }
 0x331   :  { %650 = vst [vmem:[#allocation2 + $0x21] sm:$0x1] %v645_v62  ;;  %1990 = vmatprep.subr.bf16.mxu1 %v2107_v0  ;;  %v2030_v57 = vpack.c.bf16 %v1337_v56, %v1336_v55 }
 0x333   :  { %1722 = vmatmul.mubr.f32.gmra.mrb[6].mxu1 %v642_v63  ;;  %v1338_v63 = vld [vmem:[%s2823_s2 + $0x170] sm:$0xff] }
 0x334   :  { %1992 = vmatpush3.bf16.msra.mxu1 %v1991_v17  ;;  %1724 = vmatprep.mubr.msk.f32.mxu1 %vm2108_vm0, %v2109_v4 }
 0x335   :  { %1993 = vmatprep.subr.bf16.mxu1 %v2107_v0 }
 0x336   :  { %v674_v10 = vld [vmem:[#allocation2 + $0x11] sm:$0xff]  ;;  %v651_v31 = vld [vmem:[#allocation2] sm:$0xff] }
 0x337   :  { %1725 = vmatmul.mubr.f32.gmra.mrb[8].mxu1 %v674_v10  ;;  %v652_v36 = vld [vmem:[#allocation2 + $0x8] sm:$0xff]  ;;  %v653_v41 = vld [vmem:[#allocation2 + $0x10] sm:$0xff]  ;;  %v654_v45 = vld [vmem:[#allocation2 + $0x18] sm:$0xff] }
 0x338   :  { %1995 = vmatpush3.bf16.msra.mxu1 %v1994_v6  ;;  %1727 = vmatprep.mubr.msk.f32.mxu1 %vm2108_vm0, %v2109_v4  ;;  %v676_v20 = vld [vmem:[#allocation2 + $0x21] sm:$0x1]  ;;  %v655_v53 = vld [vmem:[#allocation2 + $0x20] sm:$0x1]  ;;  %v874_v60 = vld [vmem:[#allocation2 + $0x2] sm:$0xff] }
 0x339   :  { %1996 = vmatprep.subr.bf16.mxu1 %v2107_v0  ;;  %v875_v61 = vld [vmem:[#allocation2 + $0xa] sm:$0xff]  ;;  %v876_v62 = vld [vmem:[#allocation2 + $0x12] sm:$0xff]  ;;  %v877_v17 = vld [vmem:[#allocation2 + $0x1a] sm:$0xff] }
 0x33b   :  { %1728 = vmatmul.mubr.f32.gmra.mrb[10].mxu1 %v644_v8  ;;  %v2033_v8 = vpack.c.bf16 %v1339_v58, %v1338_v63 }
 0x33c   :  { %1998 = vmatpush3.bf16.msra.mxu1 %v1997_v11  ;;  %1730 = vmatprep.mubr.msk.f32.mxu1 %vm2108_vm0, %v2109_v4 }
 0x33d   :  { %1999 = vmatprep.subr.bf16.mxu1 %v2107_v0 }
 0x33f   :  { %1731 = vmatmul.mubr.f32.gmra.mrb[12].mxu1 %v676_v20 }
 0x340   :  { %2001 = vmatpush3.bf16.msra.mxu1 %v2000_v14  ;;  %1765 = vmatprep.mubr.msk.f32.mxu1 %vm2108_vm0, %v2109_v4 }
 0x341   :  { %2002 = vmatprep.subr.bf16.mxu1 %v2107_v0 }
 0x344   :  { %2004 = vmatpush3.bf16.msra.mxu1 %v2003_v21 }
 0x345   :  { %2005 = vmatprep.subr.bf16.mxu1 %v2107_v0 }
 0x348   :  { %2007 = vmatpush3.bf16.msra.mxu1 %v2006_v24 }
 0x349   :  { %2008 = vmatprep.subr.bf16.mxu1 %v2107_v0 }
 0x34c   :  { %2010 = vmatpush3.bf16.msra.mxu1 %v2009_v27 }
 0x34d   :  { %2011 = vmatprep.subr.bf16.mxu1 %v2107_v0 }
 0x34f   :  { %1766 = vmatmul.mubr.f32.vlgmr.msra.gmra.mrb[4].mxu1 %v651_v31 }
 0x350   :  { %2013 = vmatpush3.bf16.msra.mxu1 %v2012_v15  ;;  %1768 = vmatprep.mubr.msk.f32.mxu1 %vm2108_vm0, %v2109_v4 }
 0x351   :  { %2014 = vmatprep.subr.bf16.mxu1 %v2107_v0 }
 0x353   :  { %1769 = vmatmul.mubr.f32.gmra.mrb[6].mxu1 %v652_v36 }
 0x354   :  { %2016 = vmatpush3.bf16.msra.mxu1 %v2015_v32  ;;  %1771 = vmatprep.mubr.msk.f32.mxu1 %vm2108_vm0, %v2109_v4 }
 0x355   :  { %2017 = vmatprep.subr.bf16.mxu1 %v2107_v0 }
 0x357   :  { %1772 = vmatmul.mubr.f32.gmra.mrb[8].mxu1 %v653_v41 }
 0x358   :  { %2019 = vmatpush3.bf16.msra.mxu1 %v2018_v38  ;;  %1774 = vmatprep.mubr.msk.f32.mxu1 %vm2108_vm0, %v2109_v4 }
 0x359   :  { %2020 = vmatprep.subr.bf16.mxu1 %v2107_v0 }
 0x35b   :  { %1775 = vmatmul.mubr.f32.gmra.mrb[10].mxu1 %v654_v45 }
 0x35c   :  { %2022 = vmatpush3.bf16.msra.mxu1 %v2021_v42  ;;  %1777 = vmatprep.mubr.msk.f32.mxu1 %vm2108_vm0, %v2109_v4 }
 0x35d   :  { %2023 = vmatprep.subr.bf16.mxu1 %v2107_v0 }
 0x35f   :  { %1778 = vmatmul.mubr.f32.gmra.mrb[12].mxu1 %v655_v53 }
 0x360   :  { %2025 = vmatpush3.bf16.msra.mxu1 %v2024_v46  ;;  %1812 = vmatprep.mubr.msk.f32.mxu1 %vm2108_vm0, %v2109_v4 }
 0x361   :  { %2026 = vmatprep.subr.bf16.mxu1 %v2107_v0 }
 0x364   :  { %2028 = vmatpush3.bf16.msra.mxu1 %v2027_v51 }
 0x365   :  { %2029 = vmatprep.subr.bf16.mxu1 %v2107_v0 }
 0x368   :  { %2031 = vmatpush3.bf16.msra.mxu1 %v2030_v57 }
 0x369   :  { %2032 = vmatprep.subr.bf16.mxu1 %v2107_v0  ;;  %v878_v0 = vld [vmem:[#allocation2 + $0x22] sm:$0x1] }
 0x36c   :  { %2034 = vmatpush3.bf16.msra.mxu1 %v2033_v8 }
 0x36f   :  { %1813 = vmatmul.mubr.f32.vlgmr.msra.gmra.mrb[4].mxu1 %v874_v60 }
 0x370   :  { %1815 = vmatprep.mubr.msk.f32.mxu1 %vm2108_vm0, %v2109_v4 }
 0x373   :  { %1816 = vmatmul.mubr.f32.gmra.mrb[6].mxu1 %v875_v61  ;;  %v1121_v61 = vld [vmem:[%s2824_s5] sm:$0x1] }
 0x374   :  { %1818 = vmatprep.mubr.msk.f32.mxu1 %vm2108_vm0, %v2109_v4 }
 0x377   :  { %1819 = vmatmul.mubr.f32.gmra.mrb[8].mxu1 %v876_v62 }
 0x378   :  { %1821 = vmatprep.mubr.msk.f32.mxu1 %vm2108_vm0, %v2109_v4 }
 0x37b   :  { %1822 = vmatmul.mubr.f32.gmra.mrb[10].mxu1 %v877_v17 }
 0x37c   :  { %1824 = vmatprep.mubr.msk.f32.mxu1 %vm2108_vm0, %v2109_v4 }
 0x37f   :  { %1825 = vmatmul.mubr.f32.gmra.mrb[12].mxu1 %v878_v0 }
 0x442   :  { %v2741_v1 = vpop.f32.mrb[4].mxu1 }
 0x443   :  { %v1814_v3 = vpop.f32.mrb[5].mxu1  ;;  %v996_v6 = vmul.f32 %v2741_v1, %v2462_v52 }
 0x445   :  { %v1012_v11 = vmul.f32 %v996_v6, %v2741_v1 }
 0x446   :  { %v2745_v7 = vpop.f32.mrb[6].mxu1 }
 0x447   :  { %v997_v9 = vmul.f32 %v2745_v7, %v2467_v54  ;;  %v1817_v10 = vpop.f32.mrb[7].mxu1 }
 0x449   :  { %v1001_v12 = vadd.f32 %v997_v9, %v996_v6  ;;  %v1013_v13 = vmul.f32 %v997_v9, %v2745_v7  ;;  %v1252_v9 = vld [vmem:[%s2817_s0 + $0x10] sm:$0xff] }
 0x44a   :  { %v2751_v14 = vpop.f32.mrb[8].mxu1 }
 0x44b   :  { %v1017_v18 = vadd.f32 %v1013_v13, %v1012_v11  ;;  %v998_v19 = vmul.f32 %v2751_v14, %v2478_v59  ;;  %v1820_v20 = vpop.f32.mrb[9].mxu1  ;;  %v1256_v11 = vrot.slane %v1252_v9, 7 }
 0x44d   :  { %v1002_v21 = vadd.f32 %v1001_v12, %v998_v19  ;;  %v1014_v52 = vmul.f32 %v998_v19, %v2751_v14 }
 0x44e   :  { %v2756_v22 = vpop.f32.mrb[10].mxu1 }
 0x44f   :  { %v1018_v23 = vadd.f32 %v1017_v18, %v1014_v52  ;;  %v999_v54 = vmul.f32 %v2756_v22, %v2489_v5  ;;  %v1823_v24 = vpop.f32.mrb[11].mxu1 }
 0x450   :  { %v1244_v24 = vld [vmem:[%s2817_s0] sm:$0xff] }
 0x451   :  { %v1003_v26 = vadd.f32 %v1002_v21, %v999_v54  ;;  %v1015_v27 = vmul.f32 %v999_v54, %v2756_v22 }
 0x452   :  { %v982_v28 = vpop.f32.mrb[12].mxu1 }
 0x453   :  { %v1019_v59 = vadd.f32 %v1018_v23, %v1015_v27  ;;  %v1000_v29 = vmul.f32 %v995_v25, %v982_v28  ;;  %v1826_v15 = vpop.f32.mrb[13].mxu1 }
 0x455   :  { %v1004_v30 = vsel %vm399_vm1, %v1000_v29, 0.0  ;;  %v1016_v16 = vmul.f32 %v1000_v29, %v982_v28 }
 0x456   :  { %v1005_v31 = vadd.f32 %v1004_v30, %v1003_v26 }
 0x457   :  { %v1020_v32 = vsel %vm399_vm1, %v1016_v16, 0.0 }
 0x458   :  { %v1006_v33 = vrot.slane %v1005_v31, 4  ;;  %v1021_v5 = vadd.f32 %v1020_v32, %v1019_v59 }
 0x45a   :  { %v1007_v35 = vadd.f32 %v1006_v33, %v1005_v31  ;;  %v1022_v36 = vrot.slane %v1021_v5, 4 }
 0x45c   :  { %v1008_v38 = vrot.slane %v1007_v35, 2  ;;  %v1023_v39 = vadd.f32 %v1022_v36, %v1021_v5 }
 0x45e   :  { %v1009_v40 = vadd.f32 %v1008_v38, %v1007_v35  ;;  %v1024_v41 = vrot.slane %v1023_v39, 2 }
 0x460   :  { %v1025_v42 = vadd.f32 %v1024_v41, %v1023_v39  ;;  %v1010_v43 = vrot.slane %v1009_v40, 1 }
 0x462   :  { %v1026_v44 = vrot.slane %v1025_v42, 1  ;;  %v1011_v45 = vadd.f32 %v1010_v43, %v1009_v40 }
 0x464   :  { %v1027_v46 = vadd.f32 %v1026_v44, %v1025_v42 }
 0x466   :  { %v1028_v47 = vsel %vm399_vm1, %v1011_v45, %v1027_v46 }
 0x467   :  { %1860 = vmatmul.mubr.f32.vlgmr.msra.gmra.mrb[10].mxu0 %v1028_v47 }
 0x468   :  { %1863 = vmatpush3.msra.mxu0 %v2512_v37  ;;  %1864 = vmatprep.mubr.msk.f32.mxu0 %vm2108_vm0, %v2109_v4  ;;  %v1142_v4 = vld [vmem:[%s2825_s6] sm:$0x1] }
 0x53a   :  { %v1111_v48 = vpop.f32.mrb[10].mxu0 }
 0x53b   :  { %v1115_v53 = vmul.f32 0.001953125, %v1111_v48  ;;  %v1861_v51 = vpop.f32.mrb[11].mxu0 }
 0x53d   :  { %v1116_v55 = vmul.f32 %v1115_v53, %v1115_v53 }
 0x53f   :  { %v1118_v56 = vrot.slane %v1116_v55, 7 }
 0x541   :  { %v1120_v57 = vsub.f32 %v1115_v53, %v1118_v56 }
 0x543   :  { %v1122_v63 = vadd.f32 1e-05, %v1120_v57 }
 0x545   :  { %2105 = vrsqrt.f32 %v1122_v63 }
 0x54f   :  { %v2106_v58 = vpop.eup %2105 }
 0x550   :  { %v1131_v8 = vrot.slane %v2106_v58, %v2519_v50 }
 0x552   :  { %v1132_v60 = vcombine.high %v1131_v8, %v1131_v8 }
 0x554   :  { %v1139_v37 = vrot.slane %v1132_v60, %v2519_v50  ;;  %v1253_v50 = vld [vmem:[%s2817_s0 + $0x18] sm:$0xff] }
 0x555   :  { %v1257_v12 = vrot.slane %v1253_v50, 7 }
 0x556   :  { %v1141_v62 = vmul.f32 %v1139_v37, %v1121_v61 }
 0x557   :  { %v1258_v49 = vsel %vm399_vm1, %v1256_v11, %v1257_v12 }
 0x558   :  { %v1143_v17 = vmul.f32 %v1141_v62, %v1115_v53 }
 0x55a   :  { %v1144_v0 = vsub.f32 %v1142_v4, %v1143_v17 }
 0x55c   :  { %v1149_v3 = vrot.slane %v1144_v0, %v2530_v2 }
 0x55e   :  { %v1151_v6 = vsel %vm399_vm1, %v1141_v62, %v1149_v3 }
 0x55f   :  { %1865 = vmatmul.mubr.msk.f32.vlgmr.msra.gmra.mrb[12].mxu0 %vm549_vm2, %v1151_v6 }
 0x632   :  { %v1222_v10 = vpop.f32.mrb[12].mxu0 }
 0x633   :  { %v1229_v13 = vrot.slane %v1222_v10, %v2530_v2  ;;  %v1866_v18 = vpop.f32.mrb[13].mxu0  ;;  %v1238_v19 = vrot.slane %v1222_v10, %v634_v34  ;;  %v1245_v2 = vld [vmem:[%s2817_s0 + $0x8] sm:$0xff] }
 0x635   :  { %v1230_v20 = vmul.f32 %v1229_v13, %v2741_v1  ;;  %v1231_v21 = vmul.f32 %v1229_v13, %v2745_v7  ;;  %v1232_v52 = vmul.f32 %v1229_v13, %v2751_v14  ;;  %v1233_v23 = vmul.f32 %v1229_v13, %v2756_v22 }
 0x636   :  { %v1234_v54 = vmul.f32 %v1229_v13, %v982_v28 }
 0x637   :  { %v1239_v34 = vadd.f32 %v1238_v19, %v1230_v20  ;;  %v1240_v25 = vadd.f32 %v1238_v19, %v1231_v21  ;;  %v1241_v1 = vadd.f32 %v1238_v19, %v1232_v52  ;;  %v1242_v26 = vadd.f32 %v1238_v19, %v1233_v23 }
 0x638   :  { %v1243_v7 = vadd.f32 %v1238_v19, %v1234_v54 }
 0x639   :  { %v1246_v27 = vadd.f32 %v1244_v24, %v1239_v34  ;;  %v1247_v14 = vadd.f32 %v1245_v2, %v1240_v25  ;;  %v1262_v59 = vadd.f32 %v1256_v11, %v1241_v1  ;;  %v1263_v22 = vadd.f32 %v1258_v49, %v1242_v26 }
 0x63a   :  { %v1264_v28 = vadd.f32 %v1257_v12, %v1243_v7 }
 0x63b   :  { %v1248_v29 = vmax.f32 %v1246_v27, 0.0  ;;  %v1249_v15 = vmax.f32 %v1247_v14, 0.0  ;;  %v1265_v30 = vmax.f32 %v1262_v59, 0.0  ;;  %v1266_v16 = vmax.f32 %v1263_v22, 0.0 }
 0x63c   :  { %v1267_v31 = vmax.f32 %v1264_v28, 0.0 }
 0x63d   :  { %1250 = vst [vmem:[%s2826_s10] sm:$0xff] %v1248_v29  ;;  %1251 = vst [vmem:[%s2826_s10 + $0x8] sm:$0xff] %v1249_v15 }
 0x63e   :  { %1268 = vst [vmem:[%s2826_s10 + $0xf] sm:$0xfe] %v1265_v30  ;;  %1269 = vst [vmem:[%s2826_s10 + $0x17] sm:$0xff] %v1266_v16 }
 0x63f   :  { %1270 = vst [vmem:[%s2826_s10 + $0x1f] sm:$0x1] %v1267_v31 }

</bundles_post_ra>
